<compile_context>
chip_gen: v7x
topology: tpu7x:2x2x1
jax: 0.10.0
libtpu: 0.0.40
codegen_flags: <defaults>
</compile_context>

<pallas_src>
import jax
import jax.numpy as jnp
from jax.experimental import pallas as pl
from jax.experimental.pallas import tpu as pltpu

LN_EPS = 1e-5


def _round_up(a, b):
    return (a + b - 1) // b * b


# ----------------------------------------------------------------------------
# kernels
# ----------------------------------------------------------------------------
def _prenorm_linear_kernel(x_ref, g_ref, b_ref, w_ref, bias_ref, o_ref):
    # x_ref: (block_rows, D); g/b: (1, D); w: (D, Do); bias: (1, Do)
    x = x_ref[...].astype(jnp.float32)
    g = g_ref[...].astype(jnp.float32)   # hoisted broadcast operands
    b = b_ref[...].astype(jnp.float32)

    mean = jnp.mean(x, axis=-1, keepdims=True)
    xc = x - mean
    var = jnp.mean(xc * xc, axis=-1, keepdims=True)   # biased var, like torch LN
    inv = jax.lax.rsqrt(var + LN_EPS)
    xn = xc * inv * g + b

    # MXU matmul: operands in the weight's storage dtype (bf16 weights hit the
    # native bf16 fast path), accumulation in f32.
    y = jnp.dot(xn.astype(w_ref.dtype), w_ref[...],
                preferred_element_type=jnp.float32)
    y = y + bias_ref[...].astype(jnp.float32)
    o_ref[...] = y.astype(o_ref.dtype)


def _layernorm_kernel(x_ref, g_ref, b_ref, o_ref):
    x = x_ref[...].astype(jnp.float32)
    g = g_ref[...].astype(jnp.float32)
    b = b_ref[...].astype(jnp.float32)
    mean = jnp.mean(x, axis=-1, keepdims=True)
    xc = x - mean
    var = jnp.mean(xc * xc, axis=-1, keepdims=True)
    inv = jax.lax.rsqrt(var + LN_EPS)
    o_ref[...] = (xc * inv * g + b).astype(o_ref.dtype)


# ----------------------------------------------------------------------------
# spec / tiling helpers
# ----------------------------------------------------------------------------
def _const_spec(block_shape):
    """Single-buffered BlockSpec for grid-invariant operands.

    Pallas double-buffers every input by default even when the block index
    never changes; Buffered(1) halves the VMEM held by the resident weight and
    the tiny affine params.  Falls back gracefully on older jax.
    """
    index_map = lambda i: (0, 0)
    if hasattr(pl, "Buffered"):
        try:
            return pl.BlockSpec(block_shape, index_map,
                                pipeline_mode=pl.Buffered(1))
        except TypeError:  # pipeline_mode kwarg not available
            pass
    return pl.BlockSpec(block_shape, index_map)


def _pick_block_rows(R, requested):
    """Row tile: multiple of 8 (f32 sublane), clamped to the problem size, and
    split so the row grid has >= 2 steps when possible (so v7x's two
    TensorCores both get work on a 'parallel' axis)."""
    if R <= 8:
        return R
    br = max(8, min(requested, _round_up(R, 8)))
    br = _round_up(br, 8)
    if pl.cdiv(R, br) < 2:
        br = _round_up(pl.cdiv(R, 2), 8)
    return br


# ----------------------------------------------------------------------------
# wrappers
# ----------------------------------------------------------------------------
def _prenorm_linear_2d(x2d, gamma, beta, w, bias, block_rows=512):
    R, D = x2d.shape
    Do = w.shape[1]
    br = _pick_block_rows(R, block_rows)
    grid = (pl.cdiv(R, br),)          # no host-side pad; boundary block masked

    x_itm = jnp.dtype(x2d.dtype).itemsize
    w_itm = jnp.dtype(w.dtype).itemsize
    vmem_est = (2 * br * D * x_itm            # x tile, double-buffered
                + 2 * br * Do * x_itm         # out tile, double-buffered
                + D * Do * w_itm              # weight, single-buffered
                + 4 * (2 * D + Do)            # gamma / beta / bias
                + 4 * br * (D + Do)           # f32 xn / y intermediates
                + (2 << 20))                  # Mosaic internal scratch headroom
    vmem_limit = int(min(max(vmem_est, 32 << 20), 48 << 20))

    cost = pl.CostEstimate(
        flops=2 * R * D * Do,
        transcendentals=0,
        bytes_accessed=R * D * x_itm + D * Do * w_itm + R * Do * x_itm,
    )

    return pl.pallas_call(
        _prenorm_linear_kernel,
        out_shape=jax.ShapeDtypeStruct((R, Do), x2d.dtype),
        grid=grid,
        in_specs=[
            pl.BlockSpec((br, D), lambda i: (i, 0)),
            _const_spec((1, D)),
            _const_spec((1, D)),
            _const_spec((D, Do)),
            _const_spec((1, Do)),
        ],
        out_specs=pl.BlockSpec((br, Do), lambda i: (i, 0)),
        compiler_params=pltpu.CompilerParams(
            dimension_semantics=("parallel",),
            vmem_limit_bytes=vmem_limit),
        cost_estimate=cost,
    )(x2d, gamma, beta, w, bias)


def _layernorm_2d(x2d, gamma, beta, block_rows=512):
    R, D = x2d.shape
    br = _pick_block_rows(R, block_rows)
    grid = (pl.cdiv(R, br),)

    itm = jnp.dtype(x2d.dtype).itemsize
    vmem_est = 4 * br * D * itm + 4 * br * D + 8 * D + (2 << 20)
    vmem_limit = int(min(max(vmem_est, 32 << 20), 48 << 20))

    return pl.pallas_call(
        _layernorm_kernel,
        out_shape=jax.ShapeDtypeStruct((R, D), x2d.dtype),
        grid=grid,
        in_specs=[
            pl.BlockSpec((br, D), lambda i: (i, 0)),
            _const_spec((1, D)),
            _const_spec((1, D)),
        ],
        out_specs=pl.BlockSpec((br, D), lambda i: (i, 0)),
        compiler_params=pltpu.CompilerParams(
            dimension_semantics=("parallel",),
            vmem_limit_bytes=vmem_limit),
    )(x2d, gamma, beta)


def prenorm_forward(x, params, context=None, fn_uses_context=False):
    """PreNorm(dim, fn=Linear(dim, dim), context_dim=...).forward.

    x: (B, N, dim); context: (B, M, context_dim) or None.
    The context LayerNorm is only computed when fn_uses_context — the wrapped
    fn here (Linear / FeedForward) ignores it, so by default the pass is
    skipped instead of burning HBM bandwidth on a discarded result.
    """
    B, N, D = x.shape
    x2d = x.reshape(B * N, D)

    normed_context = None
    if context is not None and fn_uses_context:
        Bc, M, Dc = context.shape
        normed_context = _layernorm_2d(
            context.reshape(Bc * M, Dc),
            params["ctx_gamma"], params["ctx_beta"]).reshape(Bc, M, Dc)

    out2d = _prenorm_linear_2d(
        x2d, params["gamma"], params["beta"], params["w"], params["b"])
    del normed_context  # fn (Linear) does not consume it
    return out2d.reshape(B, N, D)


# ----------------------------------------------------------------------------
# reference + test
# ----------------------------------------------------------------------------
def _ln_ref(v, g, b):
    m = jnp.mean(v, axis=-1, keepdims=True)
    var = jnp.mean((v - m) ** 2, axis=-1, keepdims=True)
    return (v - m) * jax.lax.rsqrt(var + LN_EPS) * g[0] + b[0]


def _reference(x, params):
    xn = _ln_ref(x, params["gamma"], params["beta"])
    return xn @ params["w"].astype(jnp.float32) + params["b"][0]


if __name__ == "__main__":
    key = jax.random.PRNGKey(0)
    B, N, D = 2, 8, 32          # x: (batch, seq, dim)
    M, Dc = 8, 16               # context: (batch, ctx_seq, context_dim)

    k = jax.random.split(key, 9)
    x = jax.random.normal(k[0], (B, N, D), dtype=jnp.float32)
    context = jax.random.normal(k[1], (B, M, Dc), dtype=jnp.float32)

    params = {
        # LayerNorm(dim): perturb away from ones/zeros so the affine is exercised.
        "gamma": (1.0 + 0.1 * jax.random.normal(k[2], (1, D))).astype(jnp.float32),
        "beta": (0.1 * jax.random.normal(k[3], (1, D))).astype(jnp.float32),
        # LayerNorm(context_dim)
        "ctx_gamma": (1.0 + 0.1 * jax.random.normal(k[4], (1, Dc))).astype(jnp.float32),
        "ctx_beta": (0.1 * jax.random.normal(k[5], (1, Dc))).astype(jnp.float32),
        # fn = Linear(dim, dim)
        "w": (jax.random.normal(k[6], (D, D)) / jnp.sqrt(D)).astype(jnp.float32),
        "b": (0.1 * jax.random.normal(k[7], (1, D))).astype(jnp.float32),
    }

    # 1) fused PreNorm + fn, f32 weights (bit-tight check).
    out = jax.block_until_ready(
        prenorm_forward(x, params, context=context, fn_uses_context=False))
    ref = _reference(x, params)
    assert out.shape == (B, N, D)
    assert jnp.allclose(out, ref, atol=1e-4, rtol=1e-4), "mismatch vs reference"

    # 2) ragged row count exercises the unpadded boundary-block (masked-store) path.
    x_odd = jax.random.normal(k[8], (B, 5, D), dtype=jnp.float32)
    out_odd = jax.block_until_ready(prenorm_forward(x_odd, params))
    assert jnp.allclose(out_odd, _reference(x_odd, params), atol=1e-4, rtol=1e-4), \
        "mismatch vs reference (ragged rows)"

    # 3) context LayerNorm path (fn_uses_context=True) + standalone LN kernel check.
    out_ctx = jax.block_until_ready(
        prenorm_forward(x, params, context=context, fn_uses_context=True))
    assert jnp.allclose(out_ctx, ref, atol=1e-4, rtol=1e-4), \
        "mismatch vs reference (context path)"
    ctx_out = jax.block_until_ready(
        _layernorm_2d(context.reshape(B * M, Dc),
                      params["ctx_gamma"], params["ctx_beta"]))
    ctx_ref = _ln_ref(context.reshape(B * M, Dc),
                      params["ctx_gamma"], params["ctx_beta"])
    assert jnp.allclose(ctx_out, ctx_ref, atol=1e-4, rtol=1e-4), "context LN mismatch"

    # 4) bf16-weight GEMM fast path (f32 accumulation; looser tolerance).
    params_bf16 = dict(params, w=params["w"].astype(jnp.bfloat16))
    out_bf16 = jax.block_until_ready(prenorm_forward(x, params_bf16))
    assert jnp.allclose(out_bf16, ref, atol=2e-2, rtol=2e-2), \
        "mismatch vs reference (bf16 weights)"

    print("KERNEL_OK")
</pallas_src>

<mosaic_0001>
module attributes {stable_mosaic.version = 11 : i64} {
  func.func @_prenorm_linear_kernel(%arg0: i32, %arg1: memref<8x32xf32, #tpu.memory_space<vmem>>, %arg2: memref<1x32xf32, #tpu.memory_space<vmem>>, %arg3: memref<1x32xf32, #tpu.memory_space<vmem>>, %arg4: memref<32x32xf32, #tpu.memory_space<vmem>>, %arg5: memref<1x32xf32, #tpu.memory_space<vmem>>, %arg6: memref<8x32xf32, #tpu.memory_space<vmem>>) attributes {dimension_semantics = [#tpu.dimension_semantics<parallel>], iteration_bounds = array<i64: 2>, scalar_prefetch = 0 : i64, scratch_operands = 0 : i64, tpu.core_type = #tpu.core_type<tc>, window_params = [{transform_indices = @transform_0, window_bounds = array<i64: 8, 32>}, {pipeline_mode = #tpu.pipeline_mode<synchronous>, transform_indices = @transform_1, window_bounds = array<i64: 1, 32>}, {pipeline_mode = #tpu.pipeline_mode<synchronous>, transform_indices = @transform_2, window_bounds = array<i64: 1, 32>}, {pipeline_mode = #tpu.pipeline_mode<synchronous>, transform_indices = @transform_3, window_bounds = array<i64: 32, 32>}, {pipeline_mode = #tpu.pipeline_mode<synchronous>, transform_indices = @transform_4, window_bounds = array<i64: 1, 32>}, {transform_indices = @transform_5, window_bounds = array<i64: 8, 32>}]} {
    %c0 = arith.constant 0 : index
    %c0_0 = arith.constant 0 : index
    %0 = vector.load %arg1[%c0, %c0_0] : memref<8x32xf32, #tpu.memory_space<vmem>>, vector<8x32xf32>
    %c0_1 = arith.constant 0 : index
    %c0_2 = arith.constant 0 : index
    %1 = vector.load %arg2[%c0_1, %c0_2] : memref<1x32xf32, #tpu.memory_space<vmem>>, vector<1x32xf32>
    %c0_3 = arith.constant 0 : index
    %c0_4 = arith.constant 0 : index
    %2 = vector.load %arg3[%c0_3, %c0_4] : memref<1x32xf32, #tpu.memory_space<vmem>>, vector<1x32xf32>
    %cst = arith.constant dense<0.000000e+00> : vector<8xf32>
    %3 = vector.multi_reduction <add>, %0, %cst [1] : vector<8x32xf32> to vector<8xf32>
    %4 = vector.shape_cast %3 : vector<8xf32> to vector<8x1xf32>
    %cst_5 = arith.constant 3.200000e+01 : f32
    %5 = vector.broadcast %cst_5 : f32 to vector<8x1xf32>
    %6 = arith.divf %4, %5 : vector<8x1xf32>
    %7 = vector.broadcast %6 : vector<8x1xf32> to vector<8x32xf32>
    %8 = arith.subf %0, %7 : vector<8x32xf32>
    %9 = arith.mulf %8, %8 : vector<8x32xf32>
    %cst_6 = arith.constant dense<0.000000e+00> : vector<8xf32>
    %10 = vector.multi_reduction <add>, %9, %cst_6 [1] : vector<8x32xf32> to vector<8xf32>
    %11 = vector.shape_cast %10 : vector<8xf32> to vector<8x1xf32>
    %cst_7 = arith.constant 3.200000e+01 : f32
    %12 = vector.broadcast %cst_7 : f32 to vector<8x1xf32>
    %13 = arith.divf %11, %12 : vector<8x1xf32>
    %cst_8 = arith.constant 9.99999974E-6 : f32
    %14 = vector.broadcast %cst_8 : f32 to vector<8x1xf32>
    %15 = arith.addf %13, %14 : vector<8x1xf32>
    %16 = math.rsqrt %15 : vector<8x1xf32>
    %17 = vector.broadcast %16 : vector<8x1xf32> to vector<8x32xf32>
    %18 = arith.mulf %8, %17 : vector<8x32xf32>
    %19 = vector.broadcast %1 : vector<1x32xf32> to vector<8x32xf32>
    %20 = arith.mulf %18, %19 : vector<8x32xf32>
    %21 = vector.broadcast %2 : vector<1x32xf32> to vector<8x32xf32>
    %22 = arith.addf %20, %21 : vector<8x32xf32>
    %c0_9 = arith.constant 0 : index
    %c0_10 = arith.constant 0 : index
    %23 = vector.load %arg4[%c0_9, %c0_10] : memref<32x32xf32, #tpu.memory_space<vmem>>, vector<32x32xf32>
    %cst_11 = arith.constant dense<0.000000e+00> : vector<8x32xf32>
    %24 = tpu.matmul %22, %23, %cst_11 {dimension_numbers = #tpu.dot_dimension_numbers<[1], [0], [0], [1], [0, 0, 1, 1], [], []>} : vector<8x32xf32>, vector<32x32xf32>, vector<8x32xf32> -> vector<8x32xf32>
    %c0_12 = arith.constant 0 : index
    %c0_13 = arith.constant 0 : index
    %25 = vector.load %arg5[%c0_12, %c0_13] : memref<1x32xf32, #tpu.memory_space<vmem>>, vector<1x32xf32>
    %26 = vector.broadcast %25 : vector<1x32xf32> to vector<8x32xf32>
    %27 = arith.addf %24, %26 : vector<8x32xf32>
    %c0_14 = arith.constant 0 : index
    %c0_15 = arith.constant 0 : index
    %28 = vector.load %arg6[%c0_14, %c0_15] : memref<8x32xf32, #tpu.memory_space<vmem>>, vector<8x32xf32>
    tpu.vector_store %arg6[%c0_14, %c0_15], %27 {strides = array<i32>} : memref<8x32xf32, #tpu.memory_space<vmem>>, vector<8x32xf32>,
    return
  }
  func.func @transform_0(%arg0: i32) -> (i32, i32) {
    %c0_i32 = arith.constant 0 : i32
    %c0_i32_0 = arith.constant 0 : i32
    return %arg0, %c0_i32 : i32, i32
  }
  func.func @transform_1(%arg0: i32) -> (i32, i32) {
    %c0_i32 = arith.constant 0 : i32
    %c0_i32_0 = arith.constant 0 : i32
    %c0_i32_1 = arith.constant 0 : i32
    return %c0_i32, %c0_i32_0 : i32, i32
  }
  func.func @transform_2(%arg0: i32) -> (i32, i32) {
    %c0_i32 = arith.constant 0 : i32
    %c0_i32_0 = arith.constant 0 : i32
    %c0_i32_1 = arith.constant 0 : i32
    return %c0_i32, %c0_i32_0 : i32, i32
  }
  func.func @transform_3(%arg0: i32) -> (i32, i32) {
    %c0_i32 = arith.constant 0 : i32
    %c0_i32_0 = arith.constant 0 : i32
    %c0_i32_1 = arith.constant 0 : i32
    return %c0_i32, %c0_i32_0 : i32, i32
  }
  func.func @transform_4(%arg0: i32) -> (i32, i32) {
    %c0_i32 = arith.constant 0 : i32
    %c0_i32_0 = arith.constant 0 : i32
    %c0_i32_1 = arith.constant 0 : i32
    return %c0_i32, %c0_i32_0 : i32, i32
  }
  func.func @transform_5(%arg0: i32) -> (i32, i32) {
    %c0_i32 = arith.constant 0 : i32
    %c0_i32_0 = arith.constant 0 : i32
    return %arg0, %c0_i32 : i32, i32
  }
}

</mosaic_0001>

<bundles_post_ra>
// kernel: tpu_custom_call.1
= control target key start
LH: loop header
LB: loop body
LE: loop exit
PB: predicated region body
PF: predicated region fallthrough
CT: control target
= control target key end

     0   :  { %10 = vsyncpa [#allocation3], 0  ;;  %s951_s0 = inlined_call_operand.hbm [shape: f32[16,32], index: 0, kind: input, shape index: {}]   ;;  %s952_s1 = inlined_call_operand.vmem [shape: f32[1,32], index: 1, kind: input, shape index: {}]   ;;  %s953_s2 = inlined_call_operand.vmem [shape: f32[1,32], index: 2, kind: input, shape index: {}]   ;;  %s954_s3 = inlined_call_operand.hbm [shape: f32[32,32], index: 3, kind: input, shape index: {}]   ;;  %s955_s4 = inlined_call_operand.vmem [shape: f32[1,32], index: 4, kind: input, shape index: {}]   ;;  %s956_s5 = inlined_call_operand.hbm [shape: f32[16,32], index: 5, kind: output, shape index: {}]  }
   0x1   :  { %12 = vsyncpa [#allocation3 + $0x1], 0 }
   0x2   :  { %13 = vsyncpa [#allocation6], 0 }
   0x3   :  { %14 = vsyncpa [#allocation4], 0 }
   0x4   :  { %16 = vsyncpa [#allocation4 + $0x1], 0  ;;  %s738_s18 = smov 0   ;;  %s740_s19 = smov 0  }
   0x5   :  { %s742_s20 = smov 0   ;;  %s744_s21 = smov 0  }
   0x6 LB: > { %s759_s22 = sadd.s32 4294967295, %s698_s21   ;;  %s466_s23 = sadd.s32 4294967294, %s698_s21   ;;  %s698_s21 = sphi %s744_s21, %s976_s21   ;;  %s694_s20 = sphi %s742_s20, %s975_s20   ;;  %s690_s19 = sphi %s740_s19, %s974_s19   ;;  %s686_s18 = sphi %s738_s18, %s973_s18  }
   0x7   : > { %p42_p0 = scmp.ne.s32.totalorder %s690_s19, %s686_s18  ;;  %p957_p1 = scmp.eq.s32.totalorder %s759_s22, 0 }
   0x8   : > { %p156_p3 = scmp.eq.s32.totalorder %s466_s23, 1  ;;  %p467_p5 = scmp.ge.s32.totalorder %s698_s21, 1 }
   0x9   : > { %p768_p4 = por %p957_p1, %p42_p0  ;;  %p163_p7 = scmp.lt.s32.totalorder %s698_s21, 3 }
   0xa   : > { %p773_p6 = por %p156_p3, %p42_p0  ;;  %s700_s27 = smov [#allocation5]  }
   0xb   : > { %s960_s24 = scalar_select %p768_p4, 1, 0 }
   0xc   : > { %s961_s25 = scalar_select %p773_p6, 1, 0 }
   0xd   : > { %p778_p8 = pnand %p467_p5, %p163_p7  ;;  %s181_s28 = sshll.u32 %s700_s27, 4  ;;  %s782_s28 = int_to_ptr.vmem [resolvable:$true] %s181_s28 }
   0xe   : > { %s794_s30 = sadd.s32 1, %s698_s21   ;;  %s29_s6 = sadd.s32 1, %s694_s20 }
   0xf   : > { %s962_s26 = scalar_select %p778_p8, 1, 0 }
  0x10   : > { %p514_p9 = pneg %p778_p8  ;;  %s26_s7 = ssub.s32 %s698_s21, %s794_s30 }
  0x11   : > { %s570_s10 = scalar_lea.hbm %s954_s3, 512 }
  0x12   : > { %p789_p11 = pnand %p514_p9, %p957_p1  ;;  %p571_p12 = scmp.ne.s32.totalorder %s954_s3, %s570_s10 }
  0x13   : > { %p577_p5 = scmp.lt.u32.totalorder %s570_s10, %s954_s3 }
  0x14   : > { %p572_p13 = pneg %p789_p11 }
  0x16   : > { %p573_p0 = pnand %p572_p13, %p571_p12 }
  0x18   : > { %p574_p3 = pneg %p573_p0 }
  0x1a   : > { %p579_p7 = pnand %p577_p5, %p574_p3 }
  0x1c   : > { %582 = shalt.err (!%p579_p7)
}
  0x1d   : > { %s583_s15 = scalar_lea.vmem %s782_s28, 512  ;;  %p591_p2 = scmp.lt.s32.totalorder %s782_s28, %s782_s28 }
  0x1e   : > { %p584_p9 = scmp.ne.s32.totalorder %s782_s28, %s583_s15  ;;  %p592_p6 = scmp.lt.s32.totalorder %s583_s15, %s583_s15 }
  0x20   : > { %p586_p10 = pnand %p584_p9, %p572_p13  ;;  %p593_p4 = por %p592_p6, %p591_p2 }
  0x22   : > { %p587_p1 = pneg %p586_p10 }
  0x24   : > { %p594_p8 = pnand %p593_p4, %p587_p1 }
  0x26   : > { %597 = shalt.err (!%p594_p8)
}
  0x27   : > { %s701_s16 = smov 128   ;;  %s702_s17 = smov 8  }
  0x28   : > { %517 = dma.hbm_to_vmem [thread:$0]  (!%p789_p11), %s954_s3, 512, %s782_s28, [#allocation6], %s701_s16, %s701_s16, %s702_s17  }
  0x29   : > { %p27_p2 = scmp.eq.s32.totalorder %s26_s7, 0  ;;  %p36_p1 = scmp.ne.s32.totalorder %s694_s20, %s690_s19 }
  0x2a   : > { %p37_p4 = scmp.eq.s32.totalorder %s698_s21, 0  ;;  %p527_p6 = scmp.lt.s32.totalorder %s698_s21, 2 }
  0x2b   : > { %s825_s8 = scalar_select %p27_p2, %s694_s20, %s29_s6  }
  0x2c   : > { %p38_p8 = por %p37_p4, %p36_p1  ;;  %p964_p10 = scmp.eq.s32.totalorder %s759_s22, 1 }
  0x2d   : > { %s198_s10 = sand.u32 1, %s694_s20   ;;  %s471_s11 = sshll.u32 %s698_s21, 7 }
  0x2e   : > { %p829_p12 = por %p964_p10, %p36_p1  ;;  %s470_s12 = sshll.u32 %s198_s10, 3 }
  0x2f   : > { %s838_s14 = scalar_lea.hbm %s951_s0, %s471_s11  ;;  %s202_s28 = scalar_lea.vmem [#allocation2], %s470_s12 }
  0x30   : > { %s209_s6 = sshll.u32 %s202_s28, 4  ;;  %p840_p11 = pnand %p527_p6, %p38_p8  ;;  %s844_s6 = int_to_ptr.vmem [resolvable:$true] %s209_s6 }
  0x31   : > { %s199_s15 = scalar_lea.sflag [#allocation3], %s198_s10  ;;  %s598_s16 = scalar_lea.hbm %s838_s14, 128 }
  0x32   : > { %p599_p13 = scmp.ne.s32.totalorder %s838_s14, %s598_s16  ;;  %p600_p0 = pneg %p840_p11 }
  0x33   : > { %s603_s27 = scalar_lea.hbm %s951_s0, 256  ;;  %p604_p7 = scmp.lt.u32.totalorder %s838_s14, %s951_s0 }
  0x34   : > { %p601_p3 = pnand %p600_p0, %p599_p13  ;;  %p605_p9 = scmp.lt.u32.totalorder %s603_s27, %s598_s16 }
  0x35   : > { %p607_p1 = scmp.lt.u32.totalorder %s598_s16, %s838_s14 }
  0x36   : > { %p602_p5 = pneg %p601_p3  ;;  %p606_p2 = por %p605_p9, %p604_p7 }
  0x38   : > { %p608_p4 = por %p607_p1, %p606_p2 }
  0x3a   : > { %p609_p6 = pnand %p608_p4, %p602_p5 }
  0x3c   : > { %612 = shalt.err (!%p609_p6)
}
  0x3d   : > { %s613_s10 = scalar_lea.vmem %s844_s6, 128  ;;  %s703_s29 = smov [#allocation2]  }
  0x3e   : > { %p614_p8 = scmp.ne.s32.totalorder %s844_s6, %s613_s10  ;;  %s618_s13 = sshll.u32 %s703_s29, 4  ;;  %s619_s13 = int_to_ptr.vmem [resolvable:$false] %s618_s13 }
  0x3f   : > { %s620_s28 = scalar_lea.vmem %s619_s13, 256  ;;  %p621_p3 = scmp.lt.s32.totalorder %s844_s6, %s619_s13 }
  0x40   : > { %p616_p10 = pnand %p614_p8, %p600_p0  ;;  %p622_p7 = scmp.lt.s32.totalorder %s620_s28, %s613_s10 }
  0x42   : > { %p617_p13 = pneg %p616_p10  ;;  %p623_p9 = por %p622_p7, %p621_p3 }
  0x44   : > { %p624_p2 = pnand %p623_p9, %p617_p13 }
  0x46   : > { %627 = shalt.err (!%p624_p2)
}
  0x47   : > { %521 = dma.hbm_to_vmem [thread:$0]  (!%p840_p11), %s838_s14, 128, %s844_s6, %s199_s15  }
  0x48   : > { %p967_p5 = scmp.ne.s32.totalorder %s962_s26, 0 }
  0x49   : > { %s874_s16 = sand.u32 (!%p967_p5), 1, %s690_s19   ;;  %p968_p0 = scmp.ne.s32.totalorder (!%p967_p5), %s960_s24, 0 }
  0x4a   : > { %218 = sbr.rel (%p967_p5) target bundleno = 627 (0x273), region = 40  ;;  %s473_s17 = sshll.u32 (!%p967_p5), %s874_s16, 3 }
  0x4b   : > { %s221_s23 = scalar_lea.sflag (!%p967_p5), [#allocation3], %s874_s16  ;;  %s224_s27 = scalar_lea.vmem (!%p967_p5), [#allocation2], %s473_s17 }
  0x51   : > { %673 = dma.done.wait (%p968_p0), %s221_s23, 128  }
  0x52   : > { %675 = vsyncadd (%p968_p0), %s221_s23, 4294967168  ;;  %p969_p11 = scmp.eq.s32.totalorder %s759_s22, 0 }
  0x54   : > { %677 = dma.done.wait (%p969_p11), [#allocation6], 512   ;;  %p970_p1 = pmov %p969_p11 }
  0x55   : > { %vm258_vm0 = vcmask 261120   ;;  %v255_v0 = vld [vmem:[%s224_s27] sm:$0xff]  ;;  %v287_v7 = vld [vmem:[#allocation5] sm:$0xff]  ;;  %v288_v8 = vld [vmem:[#allocation5 + $0x8] sm:$0xff]  ;;  %v704_v10 = vmov 0.0|0.0   ;;  %vm705_vm1 = vmmov 0  }
  0x56   : > { %679 = vsyncadd (%p970_p1), [#allocation6], 4294966784  ;;  %v259_v1 = vsel %vm258_vm0, %v255_v0, 0.0  ;;  %v289_v9 = vld [vmem:[#allocation5 + $0x10] sm:$0xff]  ;;  %500 = vmatprep.subr.bf16.mxu0 %v704_v10  ;;  %v501_v11 = vpack.c.bf16 %v288_v8, %v287_v7  ;;  %v290_v12 = vld [vmem:[#allocation5 + $0x18] sm:$0xff]  ;;  %v706_v13 = vmov 0.0  }
  0x57   : > { %260 = vadd.xlane.f32.xlu0 %v259_v1  ;;  %497 = vmatprep.mubr.msk.f32.mxu0 %vm705_vm1, %v706_v13  ;;  %v504_v14 = vpack.c.bf16 %v290_v12, %v289_v9  ;;  %v476_v19 = vld [vmem:[%s952_s1] ss:$0 sm:$0xff]  ;;  %s481_s11 = sshll.u32 %s759_s22, 7  ;;  %s254_s12 = scalar_lea.vmem [#allocation7], %s473_s17 }
  0x58   : > { %502 = vmatpush3.bf16.msra.mxu0 %v501_v11  ;;  %v477_v21 = vld [vmem:[%s953_s2] ss:$0 sm:$0xff]  ;;  %s386_s10 = sshll.u32 %s254_s12, 4  ;;  %s906_s28 = scalar_lea.hbm %s956_s5, %s481_s11  ;;  %s908_s10 = int_to_ptr.vmem [resolvable:$true] %s386_s10 }
  0x59   : > { %503 = vmatprep.subr.bf16.mxu0 %v704_v10  ;;  %v478_v24 = vld [vmem:[%s955_s4] ss:$0 sm:$0xff]  ;;  %s373_s23 = scalar_lea.sflag [#allocation4], %s874_s16  ;;  %s628_s22 = scalar_lea.vmem %s908_s10, 128 }
  0x5a   : > { %p629_p4 = scmp.ne.s32.totalorder %s908_s10, %s628_s22  ;;  %s707_s17 = smov [#allocation7]  }
  0x5b   : > { %s632_s27 = sshll.u32 %s707_s17, 4  ;;  %s633_s27 = int_to_ptr.vmem [resolvable:$false] %s632_s27 }
  0x5c   : > { %505 = vmatpush3.bf16.msra.mxu0 %v504_v14  ;;  %p630_p6 = pnand %p629_p4, %p829_p12  ;;  %s634_s24 = scalar_lea.vmem %s633_s27, 256 }
  0x5d   : > { %p635_p10 = scmp.lt.s32.totalorder %s908_s10, %s633_s27  ;;  %p636_p13 = scmp.lt.s32.totalorder %s634_s24, %s628_s22 }
  0x5e   : > { %p631_p8 = pneg %p630_p6 }
  0x5f   : > { %p637_p3 = por %p636_p13, %p635_p10 }
  0x61   : > { %p638_p7 = pnand %p637_p3, %p631_p8 }
  0xe4   : > { %v261_v2 = vpop.xlane.xlu0 %260 }
  0xe5   : > { %v263_v3 = vmul.f32 0.03125, %v261_v2 }
  0xe7   : > { %v264_v4 = vsub.f32 %v255_v0, %v263_v3 }
  0xe9   : > { %v265_v5 = vmul.f32 %v264_v4, %v264_v4 }
  0xeb   : > { %v266_v6 = vsel %vm258_vm0, %v265_v5, 0.0 }
  0xec   : > { %267 = vadd.xlane.f32.xlu0 %v266_v6 }
 0x179   : > { %v268_v15 = vpop.xlane.xlu0 %267 }
 0x17a   : > { %v269_v16 = vmul.f32 0.03125, %v268_v15 }
 0x17c   : > { %v270_v17 = vadd.f32 1e-05, %v269_v16 }
 0x17e   : > { %568 = vrsqrt.f32 %v270_v17 }
 0x188   : > { %v569_v18 = vpop.eup %568 }
 0x189   : > { %v272_v20 = vmul.f32 %v569_v18, %v264_v4 }
 0x18b   : > { %v279_v22 = vmul.f32 %v476_v19, %v272_v20 }
 0x18d   : > { %v286_v23 = vadd.f32 %v477_v21, %v279_v22 }
 0x18f   : > { %498 = vmatmul.mubr.msk.f32.vlgmr.msra.gmra.mrb[0].mxu0 %vm258_vm0, %v286_v23 }
 0x262   : > { %v367_v25 = vpop.f32.mrb[0].mxu0 }
 0x263   : > { %v368_v26 = vadd.f32 %v478_v24, %v367_v25  ;;  %v499_v27 = vpop.f32.mrb[1].mxu0 }
 0x265   : > { %371 = vst.msk [vmem:[%s254_s12] sm:$0xff] %vm258_vm0, %v368_v26 }
 0x266   : > { %641 = shalt.err (!%p638_p7)
}
 0x267   : > { %s642_s16 = scalar_lea.hbm %s906_s28, 128  ;;  %s646_s6 = scalar_lea.hbm %s956_s5, 256 }
 0x268   : > { %p643_p9 = scmp.ne.s32.totalorder %s906_s28, %s642_s16  ;;  %p647_p0 = scmp.lt.u32.totalorder %s906_s28, %s956_s5 }
 0x269   : > { %p648_p11 = scmp.lt.u32.totalorder %s646_s6, %s642_s16  ;;  %p650_p4 = scmp.lt.u32.totalorder %s642_s16, %s906_s28 }
 0x26a   : > { %p644_p2 = pnand %p643_p9, %p829_p12 }
 0x26b   : > { %p649_p1 = por %p648_p11, %p647_p0 }
 0x26c   : > { %p645_p5 = pneg %p644_p2 }
 0x26d   : > { %p651_p6 = por %p650_p4, %p649_p1 }
 0x26f   : > { %p652_p8 = pnand %p651_p6, %p645_p5 }
 0x271   : > { %655 = shalt.err (!%p652_p8)
}
 0x272   : > { %512 = dma.vmem_to_hbm [thread:$0]  (%p829_p12), %s908_s10, 128, %s906_s28, %s373_s23  }
 0x273 PF: > { %s398_s11 = sand.u32 1, %s686_s18   ;;  %p971_p10 = scmp.ne.s32.totalorder %s961_s25, 0 }
 0x274   : > { %p972_p13 = scmp.ge.s32.totalorder %s698_s21, 2  ;;  %s399_s12 = scalar_lea.sflag [#allocation4], %s398_s11 }
 0x276   : > { %p523_p3 = pnand %p972_p13, %p971_p10 }
 0x278   : > { %681 = dma.done.wait (!%p523_p3), %s399_s12, 128  }
 0x279   : > { %683 = vsyncadd (!%p523_p3), %s399_s12, 4294967168  ;;  %p19_p7 = scmp.ge.s32.totalorder %s794_s30, 4   ;;  %s973_s18 = smov %s690_s19 }
 0x27a   : > { %s974_s19 = smov %s694_s20  ;;  %s975_s20 = smov %s825_s8 }
 0x27b   : > { %s976_s21 = smov %s794_s30  ;;  %21 = sbr.rel (!%p19_p7) target bundleno = 6 (0x6), region = 89 }
 0x282   :  { %404 = vsyncpa [#allocation3], 1 }
 0x283   :  { %406 = vsyncpa [#allocation3 + $0x1], 1 }
 0x284   :  { %407 = vsyncpa [#allocation6], 1 }
 0x285   :  { %408 = vsyncpa [#allocation4], 1 }
 0x286   :  { %410 = vsyncpa [#allocation4 + $0x1], 1 }

</bundles_post_ra>
